<compile_context>
chip_gen: v7x
topology: tpu7x:2x2x1
jax: 0.10.0
libtpu: 0.0.40
codegen_flags: <defaults>
</compile_context>

<pallas_src>
import jax
import jax.numpy as jnp
from jax.experimental import pallas as pl
from jax.experimental.pallas import tpu as pltpu


# ---------------------------------------------------------------------------
# Kernel (one grid step == one LSTM layer)
# ---------------------------------------------------------------------------
def stack_lstm_kernel(x_ref, h_ref, c_ref, w_ref, b_ref,
                      y_ref, hn_ref, cn_ref, xres_ref):
    """One stacked-LSTM layer per grid step.

    x_ref   : (B, D)         raw cell input (constant over the L grid)
    h_ref   : (1, B, H)      layer-l previous hidden
    c_ref   : (1, B, H)      layer-l previous cell
    w_ref   : (1, D+H, 4H)   bf16 fused [W_ih^T ; W_hh^T] for layer l
    b_ref   : (1, 1, 4H)     f32 b_ih + b_hh for layer l
    y_ref   : (B, H)         final residual-stream output (written at l=L-1)
    hn_ref  : (1, B, H)      layer-l next hidden
    cn_ref  : (1, B, H)      layer-l next cell
    xres_ref: (B, D) f32     residual stream, persists across grid steps
    """
    l = pl.program_id(0)
    H = hn_ref.shape[-1]
    D = x_ref.shape[-1]

    @pl.when(l == 0)
    def _():
        xres_ref[...] = x_ref[...].astype(jnp.float32)

    x = xres_ref[...]                              # (B, D) f32 residual stream
    h = h_ref[0].astype(jnp.float32)               # (B, H)
    c = c_ref[0].astype(jnp.float32)               # (B, H)

    # Fused gate pre-activation as two accumulating bf16 dots (no [x;h] concat,
    # no f32 weight upcast); MXU accumulates in f32.
    w = w_ref[0]                                   # (D+H, 4H) bf16, fed as-is
    gates = (
        jnp.dot(x.astype(jnp.bfloat16), w[:D, :],
                preferred_element_type=jnp.float32)
        + jnp.dot(h.astype(jnp.bfloat16), w[D:, :],
                  preferred_element_type=jnp.float32)
        + b_ref[0]                                 # (1, 4H) f32, broadcasts
    )

    # NOTE: for real configs choose H as a multiple of 128 so these per-gate
    # lane slices (and the hn/cn stores) stay lane-aligned / lane-dense.
    i_g = jax.nn.sigmoid(gates[:, 0 * H:1 * H])
    f_g = jax.nn.sigmoid(gates[:, 1 * H:2 * H])
    g_g = jnp.tanh(gates[:, 2 * H:3 * H])
    o_g = jax.nn.sigmoid(gates[:, 3 * H:4 * H])

    c_new = f_g * c + i_g * g_g
    h_new = o_g * jnp.tanh(c_new)

    hn_ref[0] = h_new.astype(hn_ref.dtype)
    cn_ref[0] = c_new.astype(cn_ref.dtype)

    # residual: input_size == hidden_size -> fires at every layer
    # (dropout p=0 between layers is an identity and is omitted)
    x_next = h_new + x
    xres_ref[...] = x_next

    @pl.when(l == pl.num_programs(0) - 1)
    def _():
        y_ref[...] = x_next.astype(y_ref.dtype)


# ---------------------------------------------------------------------------
# One-time parameter preparation (hoisted out of the per-step path)
# ---------------------------------------------------------------------------
def prepare_params(w_ih, w_hh, b_ih, b_hh, weight_dtype=jnp.bfloat16):
    """w_ih: (L, 4H, D), w_hh: (L, 4H, H), b_ih/b_hh: (L, 4H).

    Returns (w_fused, bias) with
      w_fused : (L, D+H, 4H) in `weight_dtype` (bf16 by default)
      bias    : (L, 1, 4H)   f32   (= b_ih + b_hh)
    Call ONCE at parameter-load time, not per timestep.
    """
    L, fourH, _ = w_ih.shape
    w_fused = jnp.concatenate(
        [jnp.transpose(w_ih, (0, 2, 1)),      # (L, D, 4H)
         jnp.transpose(w_hh, (0, 2, 1))],     # (L, H, 4H)
        axis=1).astype(weight_dtype)          # (L, D+H, 4H)
    bias = (b_ih + b_hh).reshape(L, 1, fourH).astype(jnp.float32)
    return w_fused, bias


# ---------------------------------------------------------------------------
# Wrapper
# ---------------------------------------------------------------------------
def stack_lstm_cell(inputs, h_state, c_state, w_fused, bias):
    """inputs: (B, D); h_state/c_state: (L, B, H) (f32 or bf16);
    w_fused: (L, D+H, 4H) bf16; bias: (L, 1, 4H) f32.
    Returns (y, (h_next, c_next))."""
    L, B, H = h_state.shape
    D = inputs.shape[-1]
    assert D == H, "this kernel assumes input_size == hidden_size"
    assert w_fused.shape == (L, D + H, 4 * H)
    assert bias.shape == (L, 1, 4 * H)

    # Size the scoped-VMEM limit from the actual (double-buffered) blocks.
    w_bytes = (D + H) * 4 * H * jnp.dtype(w_fused.dtype).itemsize
    b_bytes = 4 * H * 4
    st_bytes = B * H * jnp.dtype(h_state.dtype).itemsize
    io_bytes = B * D * jnp.dtype(inputs.dtype).itemsize
    needed = (2 * (w_bytes + b_bytes)          # double-buffered weight + bias
              + 2 * 4 * st_bytes               # h, c, hn, cn blocks (x2 bufs)
              + 2 * 2 * io_bytes               # x input + y output
              + B * D * 4)                     # residual-stream scratch
    vmem_limit = max(needed + (8 << 20), 32 << 20)

    grid_spec = pltpu.PrefetchScalarGridSpec(
        num_scalar_prefetch=0,
        grid=(L,),
        in_specs=[
            pl.BlockSpec((B, D), lambda l: (0, 0)),               # inputs
            pl.BlockSpec((1, B, H), lambda l: (l, 0, 0)),         # h_state
            pl.BlockSpec((1, B, H), lambda l: (l, 0, 0)),         # c_state
            pl.BlockSpec((1, D + H, 4 * H), lambda l: (l, 0, 0)), # w_fused
            pl.BlockSpec((1, 1, 4 * H), lambda l: (l, 0, 0)),     # bias
        ],
        out_specs=(
            pl.BlockSpec((B, H), lambda l: (0, 0)),               # y (resident)
            pl.BlockSpec((1, B, H), lambda l: (l, 0, 0)),         # h_next
            pl.BlockSpec((1, B, H), lambda l: (l, 0, 0)),         # c_next
        ),
        scratch_shapes=[pltpu.VMEM((B, D), jnp.float32)],         # residual x
    )

    y, h_next, c_next = pl.pallas_call(
        stack_lstm_kernel,
        out_shape=(
            jax.ShapeDtypeStruct((B, H), inputs.dtype),
            jax.ShapeDtypeStruct((L, B, H), h_state.dtype),
            jax.ShapeDtypeStruct((L, B, H), c_state.dtype),
        ),
        grid_spec=grid_spec,
        compiler_params=pltpu.CompilerParams(
            dimension_semantics=("arbitrary",),   # layers are sequential
            vmem_limit_bytes=int(vmem_limit),
        ),
    )(inputs, h_state, c_state, w_fused, bias)

    return y, (h_next, c_next)


# ---------------------------------------------------------------------------
# Pure-JAX references
# ---------------------------------------------------------------------------
def stack_lstm_cell_ref(inputs, h_state, c_state, w_fused, bias):
    """Reference on the *prepared* params, mirroring the kernel's numerics
    (bf16 activations/weights into the dot, f32 accumulation + gate math)."""
    L, _, H = h_state.shape
    D = inputs.shape[-1]
    x = inputs.astype(jnp.float32)
    hs, cs = [], []
    for i in range(L):
        h = h_state[i].astype(jnp.float32)
        c = c_state[i].astype(jnp.float32)
        w = w_fused[i]
        gates = (
            jnp.dot(x.astype(jnp.bfloat16), w[:D, :],
                    preferred_element_type=jnp.float32)
            + jnp.dot(h.astype(jnp.bfloat16), w[D:, :],
                      preferred_element_type=jnp.float32)
            + bias[i]
        )
        ig = jax.nn.sigmoid(gates[:, 0 * H:1 * H])
        fg = jax.nn.sigmoid(gates[:, 1 * H:2 * H])
        gg = jnp.tanh(gates[:, 2 * H:3 * H])
        og = jax.nn.sigmoid(gates[:, 3 * H:4 * H])
        c_new = fg * c + ig * gg
        h_new = og * jnp.tanh(c_new)
        x = h_new + x if x.shape[-1] == h_new.shape[-1] else h_new
        hs.append(h_new)
        cs.append(c_new)
    return x, (jnp.stack(hs, 0), jnp.stack(cs, 0))


def stack_lstm_cell_ref_raw(inputs, h_state, c_state, w_ih, w_hh, b_ih, b_hh):
    """Reference mirroring the PyTorch module exactly (f32 weights, p=0)."""
    L, _, H = h_state.shape
    x = inputs.astype(jnp.float32)
    hs, cs = [], []
    for i in range(L):
        h = h_state[i].astype(jnp.float32)
        c = c_state[i].astype(jnp.float32)
        gates = x @ w_ih[i].T + h @ w_hh[i].T + b_ih[i] + b_hh[i]
        ig = jax.nn.sigmoid(gates[:, 0 * H:1 * H])
        fg = jax.nn.sigmoid(gates[:, 1 * H:2 * H])
        gg = jnp.tanh(gates[:, 2 * H:3 * H])
        og = jax.nn.sigmoid(gates[:, 3 * H:4 * H])
        c_new = fg * c + ig * gg
        h_new = og * jnp.tanh(c_new)
        x = h_new + x if x.shape[-1] == h_new.shape[-1] else h_new
        hs.append(h_new)
        cs.append(c_new)
    return x, (jnp.stack(hs, 0), jnp.stack(cs, 0))


# ---------------------------------------------------------------------------
if __name__ == "__main__":
    B, H, L = 8, 32, 2          # batch, hidden (== input_size), n_layers
    D = H
    key = jax.random.PRNGKey(0)
    k = jax.random.split(key, 7)
    bound = 1.0 / jnp.sqrt(H)   # PyTorch LSTMCell default init range

    inputs = jax.random.normal(k[0], (B, D), jnp.float32)
    h_state = jax.random.normal(k[1], (L, B, H), jnp.float32)
    c_state = jax.random.normal(k[2], (L, B, H), jnp.float32)
    w_ih = jax.random.uniform(k[3], (L, 4 * H, D), jnp.float32, -bound, bound)
    w_hh = jax.random.uniform(k[4], (L, 4 * H, H), jnp.float32, -bound, bound)
    b_ih = jax.random.uniform(k[5], (L, 4 * H), jnp.float32, -bound, bound)
    b_hh = jax.random.uniform(k[6], (L, 4 * H), jnp.float32, -bound, bound)

    # One-time parameter prep (outside the per-step path).
    w_fused, bias = prepare_params(w_ih, w_hh, b_ih, b_hh,
                                   weight_dtype=jnp.bfloat16)

    y, (h_next, c_next) = stack_lstm_cell(inputs, h_state, c_state,
                                          w_fused, bias)
    jax.block_until_ready((y, h_next, c_next))

    # Tight check against a reference that uses the same prepared params and
    # the same bf16-in / f32-accumulate matmul numerics.
    y_r, (h_r, c_r) = stack_lstm_cell_ref(inputs, h_state, c_state,
                                          w_fused, bias)
    assert jnp.allclose(y, y_r, atol=1e-4, rtol=1e-4)
    assert jnp.allclose(h_next, h_r, atol=1e-4, rtol=1e-4)
    assert jnp.allclose(c_next, c_r, atol=1e-4, rtol=1e-4)

    # Loose check against the exact PyTorch-layout f32 reference; the only
    # differences are the one-time bf16 weight quantization and the bf16
    # activation cast feeding the MXU.
    y_f, (h_f, c_f) = stack_lstm_cell_ref_raw(inputs, h_state, c_state,
                                              w_ih, w_hh, b_ih, b_hh)
    assert jnp.allclose(y, y_f, atol=5e-2, rtol=5e-2)
    assert jnp.allclose(h_next, h_f, atol=5e-2, rtol=5e-2)
    assert jnp.allclose(c_next, c_f, atol=5e-2, rtol=5e-2)

    print("KERNEL_OK")
</pallas_src>

<mosaic_0001>
module attributes {stable_mosaic.version = 11 : i64} {
  func.func @stack_lstm_kernel(%arg0: i32, %arg1: memref<8x32xf32, #tpu.memory_space<vmem>>, %arg2: memref<1x8x32xf32, #tpu.memory_space<vmem>>, %arg3: memref<1x8x32xf32, #tpu.memory_space<vmem>>, %arg4: memref<1x64x128xbf16, #tpu.memory_space<vmem>>, %arg5: memref<1x1x128xf32, #tpu.memory_space<vmem>>, %arg6: memref<8x32xf32, #tpu.memory_space<vmem>>, %arg7: memref<1x8x32xf32, #tpu.memory_space<vmem>>, %arg8: memref<1x8x32xf32, #tpu.memory_space<vmem>>, %arg9: memref<8x32xf32, #tpu.memory_space<vmem>>) attributes {dimension_semantics = [#tpu.dimension_semantics<arbitrary>], iteration_bounds = array<i64: 2>, scalar_prefetch = 0 : i64, scratch_operands = 1 : i64, tpu.core_type = #tpu.core_type<tc>, window_params = [{pipeline_mode = #tpu.pipeline_mode<synchronous>, transform_indices = @transform_0, window_bounds = array<i64: 8, 32>}, {transform_indices = @transform_1, window_bounds = array<i64: 1, 8, 32>}, {transform_indices = @transform_2, window_bounds = array<i64: 1, 8, 32>}, {transform_indices = @transform_3, window_bounds = array<i64: 1, 64, 128>}, {transform_indices = @transform_4, window_bounds = array<i64: 1, 1, 128>}, {pipeline_mode = #tpu.pipeline_mode<synchronous>, transform_indices = @transform_5, window_bounds = array<i64: 8, 32>}, {transform_indices = @transform_6, window_bounds = array<i64: 1, 8, 32>}, {transform_indices = @transform_7, window_bounds = array<i64: 1, 8, 32>}]} {
    %c0_i32 = arith.constant 0 : i32
    %0 = arith.cmpi eq, %arg0, %c0_i32 : i32
    %1 = arith.extui %0 : i1 to i32
    %c0_i32_0 = arith.constant 0 : i32
    %2 = arith.cmpi ne, %1, %c0_i32_0 : i32
    scf.if %2 {
      %c0_27 = arith.constant 0 : index
      %c0_28 = arith.constant 0 : index
      %57 = vector.load %arg1[%c0_27, %c0_28] : memref<8x32xf32, #tpu.memory_space<vmem>>, vector<8x32xf32>
      %c0_29 = arith.constant 0 : index
      %c0_30 = arith.constant 0 : index
      %58 = vector.load %arg9[%c0_29, %c0_30] : memref<8x32xf32, #tpu.memory_space<vmem>>, vector<8x32xf32>
      tpu.vector_store %arg9[%c0_29, %c0_30], %57 {strides = array<i32>} : memref<8x32xf32, #tpu.memory_space<vmem>>, vector<8x32xf32>,
    } else {
    }
    %c0 = arith.constant 0 : index
    %c0_1 = arith.constant 0 : index
    %3 = vector.load %arg9[%c0, %c0_1] : memref<8x32xf32, #tpu.memory_space<vmem>>, vector<8x32xf32>
    %c0_2 = arith.constant 0 : index
    %c0_3 = arith.constant 0 : index
    %c0_4 = arith.constant 0 : index
    %4 = vector.load %arg2[%c0_2, %c0_3, %c0_4] : memref<1x8x32xf32, #tpu.memory_space<vmem>>, vector<1x8x32xf32>
    %5 = vector.shape_cast %4 : vector<1x8x32xf32> to vector<8x32xf32>
    %c0_5 = arith.constant 0 : index
    %c0_6 = arith.constant 0 : index
    %c0_7 = arith.constant 0 : index
    %6 = vector.load %arg3[%c0_5, %c0_6, %c0_7] : memref<1x8x32xf32, #tpu.memory_space<vmem>>, vector<1x8x32xf32>
    %7 = vector.shape_cast %6 : vector<1x8x32xf32> to vector<8x32xf32>
    %c0_8 = arith.constant 0 : index
    %c0_9 = arith.constant 0 : index
    %c0_10 = arith.constant 0 : index
    %8 = vector.load %arg4[%c0_8, %c0_9, %c0_10] : memref<1x64x128xbf16, #tpu.memory_space<vmem>>, vector<1x64x128xbf16>
    %9 = vector.shape_cast %8 : vector<1x64x128xbf16> to vector<64x128xbf16>
    %10 = arith.truncf %3 : vector<8x32xf32> to vector<8x32xbf16>
    %11 = vector.extract_strided_slice %9 {offsets = [0, 0], sizes = [32, 128], strides = [1, 1]} : vector<64x128xbf16> to vector<32x128xbf16>
    %cst = arith.constant dense<0.000000e+00> : vector<8x128xf32>
    %12 = tpu.matmul %10, %11, %cst {dimension_numbers = #tpu.dot_dimension_numbers<[1], [0], [0], [1], [0, 0, 1, 1], [], []>} : vector<8x32xbf16>, vector<32x128xbf16>, vector<8x128xf32> -> vector<8x128xf32>
    %13 = arith.truncf %5 : vector<8x32xf32> to vector<8x32xbf16>
    %14 = vector.extract_strided_slice %9 {offsets = [32, 0], sizes = [32, 128], strides = [1, 1]} : vector<64x128xbf16> to vector<32x128xbf16>
    %cst_11 = arith.constant dense<0.000000e+00> : vector<8x128xf32>
    %15 = tpu.matmul %13, %14, %cst_11 {dimension_numbers = #tpu.dot_dimension_numbers<[1], [0], [0], [1], [0, 0, 1, 1], [], []>} : vector<8x32xbf16>, vector<32x128xbf16>, vector<8x128xf32> -> vector<8x128xf32>
    %16 = arith.addf %12, %15 : vector<8x128xf32>
    %c0_12 = arith.constant 0 : index
    %c0_13 = arith.constant 0 : index
    %c0_14 = arith.constant 0 : index
    %17 = vector.load %arg5[%c0_12, %c0_13, %c0_14] : memref<1x1x128xf32, #tpu.memory_space<vmem>>, vector<1x1x128xf32>
    %18 = vector.shape_cast %17 : vector<1x1x128xf32> to vector<1x128xf32>
    %19 = vector.broadcast %18 : vector<1x128xf32> to vector<8x128xf32>
    %20 = arith.addf %16, %19 : vector<8x128xf32>
    %21 = vector.extract_strided_slice %20 {offsets = [0, 0], sizes = [8, 32], strides = [1, 1]} : vector<8x128xf32> to vector<8x32xf32>
    %22 = arith.negf %21 : vector<8x32xf32>
    %23 = math.exp %22 : vector<8x32xf32>
    %cst_15 = arith.constant 1.000000e+00 : f32
    %24 = vector.broadcast %cst_15 : f32 to vector<8x32xf32>
    %25 = arith.addf %24, %23 : vector<8x32xf32>
    %26 = arith.divf %24, %25 : vector<8x32xf32>
    %27 = vector.extract_strided_slice %20 {offsets = [0, 32], sizes = [8, 32], strides = [1, 1]} : vector<8x128xf32> to vector<8x32xf32>
    %28 = arith.negf %27 : vector<8x32xf32>
    %29 = math.exp %28 : vector<8x32xf32>
    %cst_16 = arith.constant 1.000000e+00 : f32
    %30 = vector.broadcast %cst_16 : f32 to vector<8x32xf32>
    %31 = arith.addf %30, %29 : vector<8x32xf32>
    %32 = arith.divf %30, %31 : vector<8x32xf32>
    %33 = vector.extract_strided_slice %20 {offsets = [0, 64], sizes = [8, 32], strides = [1, 1]} : vector<8x128xf32> to vector<8x32xf32>
    %34 = math.tanh %33 : vector<8x32xf32>
    %35 = vector.extract_strided_slice %20 {offsets = [0, 96], sizes = [8, 32], strides = [1, 1]} : vector<8x128xf32> to vector<8x32xf32>
    %36 = arith.negf %35 : vector<8x32xf32>
    %37 = math.exp %36 : vector<8x32xf32>
    %cst_17 = arith.constant 1.000000e+00 : f32
    %38 = vector.broadcast %cst_17 : f32 to vector<8x32xf32>
    %39 = arith.addf %38, %37 : vector<8x32xf32>
    %40 = arith.divf %38, %39 : vector<8x32xf32>
    %41 = arith.mulf %32, %7 : vector<8x32xf32>
    %42 = arith.mulf %26, %34 : vector<8x32xf32>
    %43 = arith.addf %41, %42 : vector<8x32xf32>
    %44 = math.tanh %43 : vector<8x32xf32>
    %45 = arith.mulf %40, %44 : vector<8x32xf32>
    %c0_18 = arith.constant 0 : index
    %c0_19 = arith.constant 0 : index
    %c0_20 = arith.constant 0 : index
    %46 = vector.load %arg7[%c0_18, %c0_19, %c0_20] : memref<1x8x32xf32, #tpu.memory_space<vmem>>, vector<1x8x32xf32>
    %47 = vector.shape_cast %46 : vector<1x8x32xf32> to vector<8x32xf32>
    %48 = vector.shape_cast %45 : vector<8x32xf32> to vector<1x8x32xf32>
    tpu.vector_store %arg7[%c0_18, %c0_19, %c0_20], %48 {strides = array<i32>} : memref<1x8x32xf32, #tpu.memory_space<vmem>>, vector<1x8x32xf32>,
    %c0_21 = arith.constant 0 : index
    %c0_22 = arith.constant 0 : index
    %c0_23 = arith.constant 0 : index
    %49 = vector.load %arg8[%c0_21, %c0_22, %c0_23] : memref<1x8x32xf32, #tpu.memory_space<vmem>>, vector<1x8x32xf32>
    %50 = vector.shape_cast %49 : vector<1x8x32xf32> to vector<8x32xf32>
    %51 = vector.shape_cast %43 : vector<8x32xf32> to vector<1x8x32xf32>
    tpu.vector_store %arg8[%c0_21, %c0_22, %c0_23], %51 {strides = array<i32>} : memref<1x8x32xf32, #tpu.memory_space<vmem>>, vector<1x8x32xf32>,
    %52 = arith.addf %45, %3 : vector<8x32xf32>
    %c0_24 = arith.constant 0 : index
    %c0_25 = arith.constant 0 : index
    %53 = vector.load %arg9[%c0_24, %c0_25] : memref<8x32xf32, #tpu.memory_space<vmem>>, vector<8x32xf32>
    tpu.vector_store %arg9[%c0_24, %c0_25], %52 {strides = array<i32>} : memref<8x32xf32, #tpu.memory_space<vmem>>, vector<8x32xf32>,
    %c1_i32 = arith.constant 1 : i32
    %54 = arith.cmpi eq, %arg0, %c1_i32 : i32
    %55 = arith.extui %54 : i1 to i32
    %c0_i32_26 = arith.constant 0 : i32
    %56 = arith.cmpi ne, %55, %c0_i32_26 : i32
    scf.if %56 {
      %c0_27 = arith.constant 0 : index
      %c0_28 = arith.constant 0 : index
      %57 = vector.load %arg6[%c0_27, %c0_28] : memref<8x32xf32, #tpu.memory_space<vmem>>, vector<8x32xf32>
      tpu.vector_store %arg6[%c0_27, %c0_28], %52 {strides = array<i32>} : memref<8x32xf32, #tpu.memory_space<vmem>>, vector<8x32xf32>,
    } else {
    }
    return
  }
  func.func @transform_0(%arg0: i32) -> (i32, i32) {
    %c0_i32 = arith.constant 0 : i32
    %c0_i32_0 = arith.constant 0 : i32
    %c0_i32_1 = arith.constant 0 : i32
    return %c0_i32, %c0_i32_0 : i32, i32
  }
  func.func @transform_1(%arg0: i32) -> (i32, i32, i32) {
    %c0_i32 = arith.constant 0 : i32
    %c0_i32_0 = arith.constant 0 : i32
    %c0_i32_1 = arith.constant 0 : i32
    return %arg0, %c0_i32, %c0_i32_0 : i32, i32, i32
  }
  func.func @transform_2(%arg0: i32) -> (i32, i32, i32) {
    %c0_i32 = arith.constant 0 : i32
    %c0_i32_0 = arith.constant 0 : i32
    %c0_i32_1 = arith.constant 0 : i32
    return %arg0, %c0_i32, %c0_i32_0 : i32, i32, i32
  }
  func.func @transform_3(%arg0: i32) -> (i32, i32, i32) {
    %c0_i32 = arith.constant 0 : i32
    %c0_i32_0 = arith.constant 0 : i32
    %c0_i32_1 = arith.constant 0 : i32
    return %arg0, %c0_i32, %c0_i32_0 : i32, i32, i32
  }
  func.func @transform_4(%arg0: i32) -> (i32, i32, i32) {
    %c0_i32 = arith.constant 0 : i32
    %c0_i32_0 = arith.constant 0 : i32
    %c0_i32_1 = arith.constant 0 : i32
    return %arg0, %c0_i32, %c0_i32_0 : i32, i32, i32
  }
  func.func @transform_5(%arg0: i32) -> (i32, i32) {
    %c0_i32 = arith.constant 0 : i32
    %c0_i32_0 = arith.constant 0 : i32
    %c0_i32_1 = arith.constant 0 : i32
    return %c0_i32, %c0_i32_0 : i32, i32
  }
  func.func @transform_6(%arg0: i32) -> (i32, i32, i32) {
    %c0_i32 = arith.constant 0 : i32
    %c0_i32_0 = arith.constant 0 : i32
    %c0_i32_1 = arith.constant 0 : i32
    return %arg0, %c0_i32, %c0_i32_0 : i32, i32, i32
  }
  func.func @transform_7(%arg0: i32) -> (i32, i32, i32) {
    %c0_i32 = arith.constant 0 : i32
    %c0_i32_0 = arith.constant 0 : i32
    %c0_i32_1 = arith.constant 0 : i32
    return %arg0, %c0_i32, %c0_i32_0 : i32, i32, i32
  }
}

</mosaic_0001>

<bundles_post_ra>
// kernel: tpu_custom_call.1
= control target key start
LH: loop header
LB: loop body
LE: loop exit
PB: predicated region body
PF: predicated region fallthrough
CT: control target
= control target key end

     0   :  { %s1644_s0 = inlined_call_operand.hbm [shape: f32[8,32], index: 0, kind: input, shape index: {}]   ;;  %s1645_s1 = inlined_call_operand.hbm [shape: f32[2,8,32], index: 1, kind: input, shape index: {}]   ;;  %s1646_s2 = inlined_call_operand.hbm [shape: f32[2,8,32], index: 2, kind: input, shape index: {}]   ;;  %s1647_s3 = inlined_call_operand.hbm [shape: bf16[2,64,128], index: 3, kind: input, shape index: {}]   ;;  %s1648_s4 = inlined_call_operand.vmem [shape: f32[2,1,128], index: 4, kind: input, shape index: {}]   ;;  %s1649_s5 = inlined_call_operand.hbm [shape: f32[8,32], index: 5, kind: output, shape index: {0}]   ;;  %s1650_s6 = inlined_call_operand.hbm [shape: f32[2,8,32], index: 6, kind: output, shape index: {1}]   ;;  %s1651_s7 = inlined_call_operand.hbm [shape: f32[2,8,32], index: 7, kind: output, shape index: {2}]  }
   0x1   :  { %1665 = sst [smem:[#allocation22_spill]] %s1645_s1 }
   0x2   :  { %1666 = sst [smem:[#allocation23_spill]] %s1646_s2 }
   0x3   :  { %13 = vsyncpa [#allocation4], 0 }
   0x4   :  { %14 = vsyncpa [#allocation7], 0 }
   0x5   :  { %16 = vsyncpa [#allocation7 + $0x1], 0 }
   0x6   :  { %17 = vsyncpa [#allocation10], 0 }
   0x7   :  { %19 = vsyncpa [#allocation10 + $0x1], 0 }
   0x8   :  { %20 = vsyncpa [#allocation5], 0 }
   0x9   :  { %21 = vsyncpa [#allocation13], 0 }
   0xa   :  { %23 = vsyncpa [#allocation13 + $0x1], 0  ;;  %s1276_s24 = smov 0   ;;  %s1278_s25 = smov 0  }
   0xb   :  { %s1280_s26 = smov 0   ;;  %s1282_s27 = smov 0  }
   0xc LB: > { %1667 = sst [smem:[#allocation20_spill]] %s1216_s26  ;;  %s1297_s28 = sadd.s32 1, %s1220_s27   ;;  %s1220_s27 = sphi %s1282_s27, %s1702_s27   ;;  %s1216_s26 = sphi %s1280_s26, %s1699_s26   ;;  %s1212_s25 = sphi %s1278_s25, %s1701_s25   ;;  %s1208_s24 = sphi %s1276_s24, %s1700_s24  }
   0xd   : > { %s57_s29 = sadd.s32 1, %s1216_s26  ;;  %s54_s30 = ssub.s32 %s1220_s27, %s1297_s28 }
   0xe   : > { %p1652_p0 = scmp.ne.s32.totalorder %s1216_s26, %s1212_s25  ;;  %p55_p1 = scmp.eq.s32.totalorder %s54_s30, 0 }
   0xf   : > { %p65_p2 = scmp.eq.s32.totalorder %s1220_s27, 0  ;;  %p912_p4 = scmp.lt.s32.totalorder %s1220_s27, 2 }
  0x10   : > { %s1308_s8 = scalar_select %p55_p1, %s1216_s26, %s57_s29  }
  0x11   : > { %p66_p5 = por %p65_p2, %p1652_p0  ;;  %s256_s9 = sand.u32 1, %s1220_s27  }
  0x12   : > { %1668 = sst [smem:[#allocation21_spill]] %s1308_s8  ;;  %s1315_s10 = sand.u32 1, %s1216_s26  }
  0x13   : > { %s817_s11 = sshll.u32 %s1315_s10, 3  ;;  %s818_s12 = sshll.u32 %s1220_s27, 7 }
  0x14   : > { %s1669_s1 = sld [smem:[#allocation22_spill]]  ;;  %s260_s16 = scalar_lea.vmem [#allocation6], %s817_s11 }
  0x15   : > { %s267_s17 = sshll.u32 %s260_s16, 4  ;;  %p1326_p6 = pnand %p912_p4, %p66_p5  ;;  %s1330_s17 = int_to_ptr.vmem [resolvable:$true] %s267_s17 }
  0x16   : > { %s1671_s2 = sld [smem:[#allocation23_spill]]  ;;  %s1337_s22 = scalar_lea.sflag [#allocation7], %s256_s9 }
  0x17   : > { %s1670_s18 = scalar_select %p1326_p6, 1, 0 }
  0x18   : > { %p1343_p8 = pneg %p1326_p6 }
  0x1a   : > { %s1322_s15 = scalar_lea.hbm %s1669_s1, %s818_s12  ;;  %s975_s14 = scalar_lea.hbm %s1669_s1, 256 }
  0x1b   : > { %s970_s23 = scalar_lea.hbm %s1322_s15, 128  ;;  %p976_p11 = scmp.lt.u32.totalorder %s1322_s15, %s1669_s1 }
  0x1c   : > { %s1335_s21 = scalar_lea.hbm %s1671_s2, %s818_s12  ;;  %p971_p7 = scmp.ne.s32.totalorder %s1322_s15, %s970_s23 }
  0x1d   : > { %s1672_s29 = scalar_select %p1343_p8, 1, 0 }
  0x1e   : > { %p973_p9 = pnand %p1343_p8, %p971_p7  ;;  %p977_p12 = scmp.lt.u32.totalorder %s975_s14, %s970_s23 }
  0x1f   : > { %p979_p1 = scmp.lt.u32.totalorder %s970_s23, %s1322_s15 }
  0x20   : > { %p974_p10 = pneg %p973_p9  ;;  %p978_p13 = por %p977_p12, %p976_p11 }
  0x22   : > { %p980_p2 = por %p979_p1, %p978_p13 }
  0x24   : > { %p981_p4 = pnand %p980_p2, %p974_p10 }
  0x26   : > { %984 = shalt.err (!%p981_p4)
}
  0x27   : > { %s985_s9 = scalar_lea.vmem %s1330_s17, 128  ;;  %s1222_s19 = smov [#allocation6]  }
  0x28   : > { %p986_p5 = scmp.ne.s32.totalorder %s1330_s17, %s985_s9  ;;  %s990_s20 = sshll.u32 %s1222_s19, 4  ;;  %s991_s20 = int_to_ptr.vmem [resolvable:$false] %s990_s20 }
  0x29   : > { %s992_s30 = scalar_lea.vmem %s991_s20, 256  ;;  %p993_p3 = scmp.lt.s32.totalorder %s1330_s17, %s991_s20 }
  0x2a   : > { %p988_p7 = pnand %p986_p5, %p1343_p8  ;;  %p994_p0 = scmp.lt.s32.totalorder %s992_s30, %s985_s9 }
  0x2c   : > { %p989_p9 = pneg %p988_p7  ;;  %p995_p11 = por %p994_p0, %p993_p3 }
  0x2e   : > { %p996_p12 = pnand %p995_p11, %p989_p9 }
  0x30   : > { %999 = shalt.err (!%p996_p12)
}
  0x31   : > { %897 = dma.hbm_to_vmem [thread:$0]  (!%p1326_p6), %s1322_s15, 128, %s1330_s17, %s1337_s22  }
  0x32   : > { %s1368_s23 = sadd.s32 4294967295, %s1220_s27   ;;  %s1654_s13 = sadd.s32 4294967294, %s1220_s27  }
  0x33   : > { %p70_p0 = scmp.ne.s32.totalorder %s1212_s25, %s1208_s24  ;;  %p1655_p3 = scmp.eq.s32.totalorder %s1368_s23, 0 }
  0x34   : > { %p1653_p10 = scmp.eq.s32.totalorder %s1368_s23, 1  ;;  %p199_p13 = scmp.eq.s32.totalorder %s1654_s13, 1 }
  0x35   : > { %p1379_p1 = por %p1655_p3, %p70_p0  ;;  %p814_p2 = scmp.ge.s32.totalorder %s1220_s27, 1 }
  0x36   : > { %p1674_p4 = scmp.ne.s32.totalorder %s1216_s26, %s1212_s25  ;;  %p1393_p7 = por %p199_p13, %p70_p0 }
  0x37   : > { %s1673_s14 = scalar_select %p1379_p1, 1, 0 }
  0x38   : > { %p1389_p5 = por %p1653_p10, %p1674_p4  ;;  %p232_p9 = scmp.lt.s32.totalorder %s1220_s27, 3 }
  0x39   : > { %s1676_s24 = scalar_select %p1393_p7, 1, 0 }
  0x3a   : > { %s1675_s15 = scalar_select %p1389_p5, 1, 0 }
  0x3b   : > { %s278_s17 = scalar_lea.vmem [#allocation8], %s817_s11  ;;  %p1401_p12 = pnand %p814_p2, %p232_p9 }
  0x3c   : > { %s285_s16 = sshll.u32 %s278_s17, 4  ;;  %s1223_s9 = smov [#allocation3]   ;;  %s286_s16 = int_to_ptr.vmem [resolvable:$true] %s285_s16 }
  0x3d   : > { %s1677_s12 = scalar_select %p1401_p12, 1, 0 }
  0x3e   : > { %s245_s19 = sshll.u32 %s1223_s9, 4  ;;  %s1000_s20 = scalar_lea.hbm %s1335_s21, 128  ;;  %s1405_s19 = int_to_ptr.vmem [resolvable:$true] %s245_s19 }
  0x3f   : > { %p1001_p13 = scmp.ne.s32.totalorder %s1335_s21, %s1000_s20  ;;  %s1005_s17 = scalar_lea.hbm %s1671_s2, 256 }
  0x40   : > { %p1006_p2 = scmp.lt.u32.totalorder %s1335_s21, %s1671_s2  ;;  %p1007_p9 = scmp.lt.u32.totalorder %s1005_s17, %s1000_s20 }
  0x41   : > { %p1003_p4 = pnand %p1001_p13, %p1343_p8  ;;  %p1009_p3 = scmp.lt.u32.totalorder %s1000_s20, %s1335_s21 }
  0x42   : > { %p1008_p11 = por %p1007_p9, %p1006_p2 }
  0x43   : > { %p1004_p10 = pneg %p1003_p4 }
  0x44   : > { %p1010_p7 = por %p1009_p3, %p1008_p11 }
  0x46   : > { %p1011_p5 = pnand %p1010_p7, %p1004_p10 }
  0x48   : > { %1014 = shalt.err (!%p1011_p5)
}
  0x49   : > { %s1015_s9 = scalar_lea.vmem %s286_s16, 128  ;;  %s1224_s8 = smov [#allocation8]  }
  0x4a   : > { %p1016_p0 = scmp.ne.s32.totalorder %s286_s16, %s1015_s9  ;;  %s1020_s26 = sshll.u32 %s1224_s8, 4  ;;  %s1021_s26 = int_to_ptr.vmem [resolvable:$false] %s1020_s26 }
  0x4b   : > { %s1022_s11 = scalar_lea.vmem %s1021_s26, 256  ;;  %p1023_p1 = scmp.lt.s32.totalorder %s286_s16, %s1021_s26 }
  0x4c   : > { %p1018_p13 = pnand %p1016_p0, %p1343_p8  ;;  %p1024_p12 = scmp.lt.s32.totalorder %s1022_s11, %s1015_s9 }
  0x4e   : > { %p1019_p4 = pneg %p1018_p13  ;;  %p1025_p6 = por %p1024_p12, %p1023_p1 }
  0x50   : > { %p1026_p2 = pnand %p1025_p6, %p1019_p4 }
  0x52   : > { %1029 = shalt.err (!%p1026_p2)
}
  0x53   : > { %p1678_p9 = scmp.ne.s32.totalorder %s1670_s18, 0  ;;  %p1679_p3 = scmp.eq.s32.totalorder %s1368_s23, 0 }
  0x54   : > { %p1680_p10 = scmp.ne.s32.totalorder %s1677_s12, 0  ;;  %s821_s26 = sshll.u32 %s1315_s10, 5 }
  0x55   : > { %900 = dma.hbm_to_vmem [thread:$0]  (!%p1678_p9), %s1335_s21, 128, %s286_s16, %s1337_s22  }
  0x56   : > { %p1681_p5 = pneg %p1680_p10  ;;  %s849_s8 = sshll.u32 %s1220_s27, 9 }
  0x57   : > { %s1441_s30 = scalar_lea.hbm %s1647_s3, %s849_s8  ;;  %s1030_s11 = scalar_lea.hbm %s1644_s0, 128 }
  0x58   : > { %p1432_p7 = pnand %p1681_p5, %p1679_p3  ;;  %p1031_p6 = scmp.ne.s32.totalorder %s1644_s0, %s1030_s11 }
  0x59   : > { %p1037_p0 = scmp.lt.u32.totalorder %s1030_s11, %s1644_s0 }
  0x5a   : > { %p1032_p1 = pneg %p1432_p7 }
  0x5c   : > { %p1033_p11 = pnand %p1032_p1, %p1031_p6 }
  0x5e   : > { %p1034_p12 = pneg %p1033_p11 }
  0x60   : > { %p1039_p13 = pnand %p1037_p0, %p1034_p12 }
  0x62   : > { %1042 = shalt.err (!%p1039_p13)
}
  0x63   : > { %s1043_s8 = scalar_lea.vmem %s1405_s19, 128  ;;  %p1051_p5 = scmp.lt.s32.totalorder %s1405_s19, %s1405_s19 }
  0x64   : > { %p1044_p4 = scmp.ne.s32.totalorder %s1405_s19, %s1043_s8  ;;  %p1052_p10 = scmp.lt.s32.totalorder %s1043_s8, %s1043_s8 }
  0x66   : > { %p1046_p2 = pnand %p1044_p4, %p1032_p1  ;;  %p1053_p9 = por %p1052_p10, %p1051_p5 }
  0x68   : > { %p1047_p3 = pneg %p1046_p2 }
  0x6a   : > { %p1054_p8 = pnand %p1053_p9, %p1047_p3 }
  0x6c   : > { %1057 = shalt.err (!%p1054_p8)
}
  0x6d   : > { %893 = dma.hbm_to_vmem [thread:$0]  (!%p1432_p7), %s1644_s0, 128, %s1405_s19, [#allocation4]  }
  0x6e   : > { %s296_s20 = scalar_lea.vmem [#allocation9], %s821_s26  ;;  %s293_s9 = scalar_lea.sflag [#allocation10], %s1315_s10 }
  0x6f   : > { %s303_s17 = sshll.u32 %s296_s20, 4  ;;  %s1058_s11 = scalar_lea.hbm %s1441_s30, 512  ;;  %s1464_s17 = int_to_ptr.vmem [resolvable:$true] %s303_s17 }
  0x70   : > { %p1059_p8 = scmp.ne.s32.totalorder %s1441_s30, %s1058_s11  ;;  %p1683_p9 = scmp.ne.s32.totalorder %s1672_s29, 0 }
  0x71   : > { %s1063_s22 = scalar_lea.hbm %s1647_s3, 1024  ;;  %p1064_p1 = scmp.lt.u32.totalorder %s1441_s30, %s1647_s3 }
  0x72   : > { %p1061_p10 = pnand %p1059_p8, %p1683_p9  ;;  %p1065_p11 = scmp.lt.u32.totalorder %s1063_s22, %s1058_s11 }
  0x73   : > { %p1067_p12 = scmp.lt.u32.totalorder %s1058_s11, %s1441_s30 }
  0x74   : > { %p1062_p6 = pneg %p1061_p10  ;;  %p1066_p7 = por %p1065_p11, %p1064_p1 }
  0x76   : > { %p1068_p0 = por %p1067_p12, %p1066_p7 }
  0x78   : > { %p1069_p13 = pnand %p1068_p0, %p1062_p6 }
  0x7a   : > { %1072 = shalt.err (!%p1069_p13)
}
  0x7b   : > { %s1073_s19 = scalar_lea.vmem %s1464_s17, 512  ;;  %s1225_s26 = smov [#allocation9]  }
  0x7c   : > { %p1074_p4 = scmp.ne.s32.totalorder %s1464_s17, %s1073_s19  ;;  %s1078_s2 = sshll.u32 %s1225_s26, 4  ;;  %s1079_s2 = int_to_ptr.vmem [resolvable:$false] %s1078_s2 }
  0x7d   : > { %s1080_s13 = scalar_lea.vmem %s1079_s2, 1024  ;;  %p1081_p5 = scmp.lt.s32.totalorder %s1464_s17, %s1079_s2 }
  0x7e   : > { %p1076_p2 = pnand %p1074_p4, %p1683_p9  ;;  %p1082_p8 = scmp.lt.s32.totalorder %s1080_s13, %s1073_s19 }
  0x80   : > { %p1077_p3 = pneg %p1076_p2  ;;  %p1083_p10 = por %p1082_p8, %p1081_p5 }
  0x82   : > { %p1084_p1 = pnand %p1083_p10, %p1077_p3 }
  0x84   : > { %1087 = shalt.err (!%p1084_p1)
}
  0x85   : > { %s1226_s20 = smov 64   ;;  %s1227_s11 = smov 4  }
  0x86   : > { %p1684_p6 = scmp.ne.s32.totalorder %s1670_s18, 0  ;;  %p1685_p9 = scmp.ne.s32.totalorder %s1677_s12, 0 }
  0x87   : > { %p1686_p11 = scmp.eq.s32.totalorder (!%p1685_p9), %s1368_s23, 0 }
  0x88   : > { %903 = dma.hbm_to_vmem [thread:$0]  (!%p1684_p6), %s1441_s30, 512, %s1464_s17, %s293_s9, %s1226_s20, %s1226_s20, %s1227_s11  }
  0x89   : > { %321 = sbr.rel (%p1685_p9) target bundleno = 957 (0x3bd), region = 40 }
  0x90   : > { %1187 = dma.done.wait (%p1686_p11), [#allocation4], 128   ;;  %p1687_p7 = pmov %p1686_p11 }
  0x91   : > { %s327_s29 = sand.u32 1, %s1368_s23   ;;  %s329_s1 = sand.u32 1, %s1212_s25  }
  0x92   : > { %1189 = vsyncadd (%p1687_p7), [#allocation4], 4294967168  ;;  %s1498_s21 = sshll.u32 %s329_s1, 3  ;;  %s328_s10 = scalar_lea.sflag [#allocation7], %s327_s29 }
  0x93   : > { %s331_s18 = scalar_lea.vmem [#allocation6], %s1498_s21  ;;  %p1688_p12 = scmp.ne.s32.totalorder %s1673_s14, 0 }
  0x95   : > { %1191 = dma.done.wait (%p1688_p12), %s328_s10, 256  }
  0x96   : > { %1193 = vsyncadd (%p1688_p12), %s328_s10, 4294967040  ;;  %s828_s12 = sshll.u32 %s329_s1, 5  ;;  %s340_s30 = scalar_lea.vmem [#allocation8], %s1498_s21 }
  0x97   : > { %s346_s17 = scalar_lea.sflag [#allocation10], %s329_s1  ;;  %s349_s9 = scalar_lea.vmem [#allocation9], %s828_s12 }
  0x98   : > { %1195 = dma.done.wait (%p1688_p12), %s346_s17, 512  }
  0x99   : > { %1197 = vsyncadd (%p1688_p12), %s346_s17, 4294966784  ;;  %p398_p0 = scmp.lt.s32.totalorder %s1368_s23, 1  ;;  %s390_s26 = scalar_lea.vmem [#allocation12], %s1498_s21 }
  0x9a   : > { %s397_s2 = scalar_lea.vmem [#allocation14], %s1498_s21  ;;  %p1689_p13 = scmp.ne.s32.totalorder %s1368_s23, 0 }
  0x9b   : > { %s1514_s22 = scalar_select %p398_p0, %s1368_s23, 1 }
  0x9c   : > { %405 = sbr.rel (%p1689_p13) target bundleno = 163 (0xa3), region = 60  ;;  %v406_v0 = vld [vmem:[#allocation3] sm:$0xff] (!%p1689_p13)  ;;  %vm407_vm0 = vcmask (!%p1689_p13), 261120  }
  0x9d   : > { %s400_s19 = scalar_lea.vmem %s1648_s4, %s1514_s22  ;;  %408 = vst.msk [vmem:[#allocation2] sm:$0xff] (!%p1689_p13), %vm407_vm0, %v406_v0 }
  0xa3 PF: > { %v958_v1 = vld [vmem:[%s349_s9 + $0x10] sm:$0xff]   ;;  %v1228_v2 = vmov 0.0   ;;  %v959_v3 = vld [vmem:[%s349_s9] sm:$0xff]   ;;  %v960_v4 = vld [vmem:[%s349_s9 + $0x18] sm:$0xff]   ;;  %vm1229_vm1 = vmmov 0   ;;  %vm434_vm2 = vcmask 261120  }
  0xa4   : > { %856 = vmatprep.subr.bf16.mxu0 %v1228_v2  ;;  %864 = vmatprep.subr.bf16.mxu1 %v1228_v2  ;;  %v961_v5 = vld [vmem:[%s349_s9 + $0x8] sm:$0xff]   ;;  %v409_v7 = vld [vmem:[#allocation2] sm:$0xff]  ;;  %s1230_s20 = smov 64   ;;  %s1231_s11 = smov 32  }
  0xa5   : > { %857 = vmatpush3.bf16.msra.mxu0 %v958_v1  ;;  %860 = vmatprep.mubr.msk.bf16.mxu0 %vm1229_vm1, %v1228_v2  ;;  %v410_v6 = vld [vmem:[%s331_s18] sm:$0xff]  ;;  %v420_v9 = vpack.c.bf16 %v409_v7, %v409_v7  ;;  %v838_v12 = vld [vmem:[%s400_s19] ss:$0 sm:$0xff]  ;;  %s1232_s1 = smov 96   ;;  %p840_p4 = scmp.ne.s32.totalorder %s1368_s23, 1 }
  0xa6   : > { %865 = vmatpush3.bf16.msra.mxu1 %v959_v3  ;;  %858 = vmatprep.subr.bf16.mxu0 %v1228_v2  ;;  %v421_v8 = vpack.c.bf16 %v410_v6, %v410_v6  ;;  %v411_v22 = vld [vmem:[%s340_s30] sm:$0xff] }
  0xa7   : > { %866 = vmatprep.subr.bf16.mxu1 %v1228_v2  ;;  %868 = vmatprep.mubr.msk.bf16.mxu1 %vm1229_vm1, %v1228_v2 }
  0xa9   : > { %859 = vmatpush3.bf16.msra.mxu0 %v960_v4 }
  0xaa   : > { %867 = vmatpush3.bf16.msra.mxu1 %v961_v5 }
  0xac   : > { %861 = vmatmul.mubr.msk.bf16.vlgmr.msra.gmra.mrb[0].mxu0 %vm434_vm2, %v421_v8 }
  0xad   : > { %869 = vmatmul.mubr.msk.bf16.vlgmr.msra.gmra.mrb[0].mxu1 %vm434_vm2, %v420_v9 }
 0x17f   : > { %v472_v10 = vpop.f32.mrb[0].mxu0 }
 0x180   : > { %v527_v11 = vpop.f32.mrb[0].mxu1  ;;  %v862_v13 = vpop.f32.mrb[1].mxu0 }
 0x181   : > { %v528_v14 = vadd.f32 %v527_v11, %v472_v10  ;;  %v870_v15 = vpop.f32.mrb[1].mxu1  ;;  %v475_v16 = vpop.f32.mrb[2].mxu0 }
 0x182   : > { %v530_v17 = vpop.f32.mrb[2].mxu1  ;;  %v863_v18 = vpop.f32.mrb[3].mxu0 }
 0x183   : > { %v540_v19 = vadd.f32 %v838_v12, %v528_v14  ;;  %v871_v20 = vpop.f32.mrb[3].mxu1 }
 0x185   : > { %962 = vtanh.f32 %v540_v19  ;;  %v839_v23 = vmul.f32 -1.442695, %v540_v19 }
 0x187   : > { %964 = vpow2.f32 %v839_v23 }
 0x18f   : > { %v963_v21 = vpop.eup %962 }
 0x190   : > { %554 = vrot.lane.b32.xlu0 %v963_v21, %s1230_s20 }
 0x191   : > { %v965_v24 = vpop.eup %964 }
 0x192   : > { %v544_v25 = vadd.f32 1.0, %v965_v24 }
 0x194   : > { %549 = vrot.lane.b32.xlu0 %v411_v22, %s1231_s11  ;;  %966 = vrcp.f32 %v544_v25 }
 0x198   : > { %580 = vrot.lane.b32.xlu0 %v409_v7, %s1232_s1 }
 0x19e   : > { %v967_v26 = vpop.eup %966 }
 0x202   : > { %v555_v27 = vpop.permute.xlu0 %554 }
 0x203   : > { %v557_v28 = vmul.f32 %v967_v26, %v555_v27 }
 0x205   : > { %559 = vrot.lane.b32.xlu1 %v557_v28, %s1231_s11 }
 0x206   : > { %v550_v29 = vpop.permute.xlu0 %549 }
 0x207   : > { %v552_v30 = vmul.f32 %v967_v26, %v550_v29 }
 0x20a   : > { %v581_v34 = vpop.permute.xlu0 %580 }
 0x277   : > { %v560_v31 = vpop.permute.xlu1 %559 }
 0x278   : > { %v562_v32 = vadd.f32 %v560_v31, %v552_v30 }
 0x27a   : > { %968 = vtanh.f32 %v562_v32  ;;  %575 = vrot.lane.b32.xlu0 %v562_v32, %s1232_s1 }
 0x284   : > { %v969_v33 = vpop.eup %968 }
 0x285   : > { %565 = vrot.lane.b32.xlu1 %v969_v33, %s1230_s20 }
 0x2ec   : > { %v576_v35 = vpop.permute.xlu0 %575 }
 0x2ed   : > { %578 = vst.msk [vmem:[%s397_s2] sm:$0xff] %vm434_vm2, %v576_v35 }
 0x2f7   : > { %v566_v36 = vpop.permute.xlu1 %565 }
 0x2f8   : > { %v568_v37 = vmul.f32 %v967_v26, %v566_v36 }
 0x2fa   : > { %570 = vrot.lane.b32.xlu1 %v568_v37, %s1231_s11  ;;  %v583_v38 = vadd.f32 %v581_v34, %v568_v37 }
 0x2fe   : > { %585 = vrot.lane.b32.xlu1 %v583_v38, %s1231_s11 }
 0x36b   : > { %592 = sbr.rel (%p840_p4) target bundleno = 882 (0x372), region = 64 }
 0x36c   : > { %v571_v39 = vpop.permute.xlu1 %570 }
 0x36d   : > { %573 = vst.msk [vmem:[%s390_s26] sm:$0xff] %vm434_vm2, %v571_v39 }
 0x370   : > { %v586_v40 = vpop.permute.xlu1 %585 }
 0x371   : > { %588 = vst.msk [vmem:[#allocation2] sm:$0xff] %vm434_vm2, %v586_v40  ;;  %593 = vst.msk [vmem:[#allocation11] sm:$0xff] (!%p840_p4), %vm434_vm2, %v586_v40 }
 0x372 PF: > { %s844_s10 = sshll.u32 %s1368_s23, 7  ;;  %s624_s17 = sshll.u32 %s390_s26, 4  ;;  %s625_s17 = int_to_ptr.vmem [resolvable:$true] %s624_s17 }
 0x373   : > { %s1550_s30 = scalar_lea.hbm %s1650_s6, %s844_s10  ;;  %s1556_s9 = scalar_lea.sflag [#allocation13], %s327_s29 }
 0x374   : > { %s1088_s22 = scalar_lea.vmem %s625_s17, 128  ;;  %p1690_p3 = scmp.ne.s32.totalorder %s1675_s15, 0 }
 0x375   : > { %p1089_p2 = scmp.ne.s32.totalorder %s625_s17, %s1088_s22  ;;  %s1233_s16 = smov [#allocation12]  }
 0x376   : > { %s1092_s8 = sshll.u32 %s1233_s16, 4  ;;  %s1093_s8 = int_to_ptr.vmem [resolvable:$false] %s1092_s8 }
 0x377   : > { %p1090_p5 = pnand %p1089_p2, %p1690_p3  ;;  %s1094_s19 = scalar_lea.vmem %s1093_s8, 256 }
 0x378   : > { %p1095_p10 = scmp.lt.s32.totalorder %s625_s17, %s1093_s8  ;;  %p1096_p1 = scmp.lt.s32.totalorder %s1094_s19, %s1088_s22 }
 0x379   : > { %p1091_p8 = pneg %p1090_p5 }
 0x37a   : > { %p1097_p6 = por %p1096_p1, %p1095_p10 }
 0x37c   : > { %p1098_p9 = pnand %p1097_p6, %p1091_p8 }
 0x37e   : > { %1101 = shalt.err (!%p1098_p9)
}
 0x37f   : > { %s1102_s29 = scalar_lea.hbm %s1550_s30, 128  ;;  %s1106_s13 = scalar_lea.hbm %s1650_s6, 256 }
 0x380   : > { %p1103_p11 = scmp.ne.s32.totalorder %s1550_s30, %s1102_s29  ;;  %p1107_p0 = scmp.lt.u32.totalorder %s1550_s30, %s1650_s6 }
 0x381   : > { %p1108_p13 = scmp.lt.u32.totalorder %s1106_s13, %s1102_s29  ;;  %p1110_p2 = scmp.lt.u32.totalorder %s1102_s29, %s1550_s30 }
 0x382   : > { %p1104_p7 = pnand %p1103_p11, %p1690_p3 }
 0x383   : > { %p1109_p4 = por %p1108_p13, %p1107_p0 }
 0x384   : > { %p1105_p12 = pneg %p1104_p7 }
 0x385   : > { %p1111_p5 = por %p1110_p2, %p1109_p4 }
 0x387   : > { %p1112_p8 = pnand %p1111_p5, %p1105_p12 }
 0x389   : > { %1115 = shalt.err (!%p1112_p8)
}
 0x38a   : > { %884 = dma.vmem_to_hbm [thread:$0]  (%p1690_p3), %s625_s17, 128, %s1550_s30, %s1556_s9  }
 0x38b   : > { %s1234_s1 = smov [#allocation11]   ;;  %s1581_s16 = scalar_lea.hbm %s1651_s7, %s844_s10 }
 0x38c   : > { %s611_s18 = sshll.u32 %s1234_s1, 4  ;;  %s637_s8 = sshll.u32 %s397_s2, 4  ;;  %s612_s18 = int_to_ptr.vmem [resolvable:$true] %s611_s18  ;;  %s638_s8 = int_to_ptr.vmem [resolvable:$true] %s637_s8 }
 0x38d   : > { %s1116_s19 = scalar_lea.vmem %s612_s18, 128  ;;  %p1691_p1 = scmp.eq.s32.totalorder %s1368_s23, 1 }
 0x38e   : > { %p1117_p10 = scmp.ne.s32.totalorder %s612_s18, %s1116_s19  ;;  %p1123_p11 = scmp.lt.s32.totalorder %s612_s18, %s612_s18 }
 0x38f   : > { %p1124_p7 = scmp.lt.s32.totalorder %s1116_s19, %s1116_s19 }
 0x390   : > { %p1118_p6 = pnand %p1117_p10, %p1691_p1 }
 0x391   : > { %p1125_p12 = por %p1124_p7, %p1123_p11 }
 0x392   : > { %p1119_p9 = pneg %p1118_p6 }
 0x394   : > { %p1126_p0 = pnand %p1125_p12, %p1119_p9 }
 0x396   : > { %1129 = shalt.err (!%p1126_p0)
}
 0x397   : > { %s1130_s29 = scalar_lea.hbm %s1649_s5, 128  ;;  %p1692_p4 = pmov %p1691_p1 }
 0x398   : > { %p1131_p13 = scmp.ne.s32.totalorder %s1649_s5, %s1130_s29  ;;  %p1136_p8 = scmp.lt.u32.totalorder %s1130_s29, %s1649_s5 }
 0x39a   : > { %p1132_p2 = pnand %p1131_p13, %p1692_p4 }
 0x39c   : > { %p1133_p5 = pneg %p1132_p2 }
 0x39e   : > { %p1138_p10 = pnand %p1136_p8, %p1133_p5 }
 0x3a0   : > { %1141 = shalt.err (!%p1138_p10)
}
 0x3a1   : > { %883 = dma.vmem_to_hbm [thread:$0]  (%p1691_p1), %s612_s18, 128, %s1649_s5, [#allocation5]  }
 0x3a2   : > { %s1142_s20 = scalar_lea.vmem %s638_s8, 128  ;;  %s1235_s11 = smov [#allocation14]  }
 0x3a3   : > { %p1143_p6 = scmp.ne.s32.totalorder %s638_s8, %s1142_s20  ;;  %s1146_s1 = sshll.u32 %s1235_s11, 4  ;;  %s1147_s1 = int_to_ptr.vmem [resolvable:$false] %s1146_s1 }
 0x3a4   : > { %s1148_s12 = scalar_lea.vmem %s1147_s1, 256  ;;  %p1149_p7 = scmp.lt.s32.totalorder %s638_s8, %s1147_s1 }
 0x3a5   : > { %p1144_p9 = pnand %p1143_p6, %p1690_p3  ;;  %p1150_p12 = scmp.lt.s32.totalorder %s1148_s12, %s1142_s20 }
 0x3a7   : > { %p1145_p11 = pneg %p1144_p9  ;;  %p1151_p0 = por %p1150_p12, %p1149_p7 }
 0x3a9   : > { %p1152_p13 = pnand %p1151_p0, %p1145_p11 }
 0x3ab   : > { %1155 = shalt.err (!%p1152_p13)
}
 0x3ac   : > { %s1156_s18 = scalar_lea.hbm %s1581_s16, 128  ;;  %s1160_s30 = scalar_lea.hbm %s1651_s7, 256 }
 0x3ad   : > { %p1157_p4 = scmp.ne.s32.totalorder %s1581_s16, %s1156_s18  ;;  %p1161_p8 = scmp.lt.u32.totalorder %s1581_s16, %s1651_s7 }
 0x3ae   : > { %p1162_p10 = scmp.lt.u32.totalorder %s1160_s30, %s1156_s18  ;;  %p1164_p6 = scmp.lt.u32.totalorder %s1156_s18, %s1581_s16 }
 0x3af   : > { %p1158_p2 = pnand %p1157_p4, %p1690_p3 }
 0x3b0   : > { %p1163_p1 = por %p1162_p10, %p1161_p8 }
 0x3b1   : > { %p1159_p5 = pneg %p1158_p2 }
 0x3b2   : > { %p1165_p9 = por %p1164_p6, %p1163_p1 }
 0x3b4   : > { %p1166_p11 = pnand %p1165_p9, %p1159_p5 }
 0x3b6   : > { %1169 = shalt.err (!%p1166_p11)
}
 0x3b7   : > { %885 = dma.vmem_to_hbm [thread:$0]  (%p1690_p3), %s638_s8, 128, %s1581_s16, %s1556_s9  }
 0x3b8   : > { %p1693_p7 = scmp.eq.s32.totalorder %s1368_s23, 1 }
 0x3ba   : > { %1199 = dma.done.wait (%p1693_p7), [#allocation5], 128   ;;  %p1694_p12 = pmov %p1693_p7 }
 0x3bc   : > { %1201 = vsyncadd (%p1694_p12), [#allocation5], 4294967168 }
 0x3bd PF: > { %s1695_s10 = sadd.s32 4294967294, %s1220_s27   ;;  %p1696_p0 = scmp.ne.s32.totalorder %s1676_s24, 0 }
 0x3be   : > { %s653_s26 = sand.u32 1, %s1695_s10   ;;  %p1697_p13 = scmp.ge.s32.totalorder %s1220_s27, 2 }
 0x3bf   : > { %s654_s21 = scalar_lea.sflag [#allocation13], %s653_s26 }
 0x3c0   : > { %p905_p4 = pnand %p1697_p13, %p1696_p0 }
 0x3c2   : > { %1203 = dma.done.wait (!%p905_p4), %s654_s21, 256  }
 0x3c3   : > { %1205 = vsyncadd (!%p905_p4), %s654_s21, 4294967040  ;;  %s1698_s15 = sld [smem:[#allocation20_spill]]  ;;  %s1699_s26 = sld [smem:[#allocation21_spill]] }
 0x3c4   : > { %p26_p3 = scmp.ge.s32.totalorder %s1297_s28, 4   ;;  %s1700_s24 = smov %s1212_s25 }
 0x3c5   : > { %s1702_s27 = smov %s1297_s28 }
 0x3c6   :  { %28 = sbr.rel (!%p26_p3) target bundleno = 12 (0xc), region = 149 }
 0x3c9   : > { %s1701_s25 = smov %s1698_s15 }
 0x3cd   :  { %668 = vsyncpa [#allocation4], 1 }
 0x3ce   :  { %670 = vsyncpa [#allocation4 + $0x1], 1 }
 0x3cf   :  { %671 = vsyncpa [#allocation7], 1 }
 0x3d0   :  { %673 = vsyncpa [#allocation7 + $0x1], 1 }
 0x3d1   :  { %674 = vsyncpa [#allocation10], 1 }
 0x3d2   :  { %676 = vsyncpa [#allocation10 + $0x1], 1 }
 0x3d3   :  { %677 = vsyncpa [#allocation5], 1 }
 0x3d4   :  { %679 = vsyncpa [#allocation5 + $0x1], 1 }
 0x3d5   :  { %680 = vsyncpa [#allocation13], 1 }
 0x3d6   :  { %682 = vsyncpa [#allocation13 + $0x1], 1 }

</bundles_post_ra>
